<compile_context>
chip_gen: v5e
topology: v5e:2x2
jax: 0.10.0
libtpu: 0.0.40
codegen_flags: <defaults>
</compile_context>

<pallas_src>
import functools

import jax
import jax.numpy as jnp
from jax.experimental import pallas as pl
from jax.experimental.pallas import tpu as pltpu


def _ece_kernel(x_ref, t_ref, o_ref, sconf_ref, sacc_ref, *,
                n_bins: int, n_rows: int, tile_n: int, nb_pad: int,
                is_prob: bool):
    pid = pl.program_id(0)

    # --- init resident accumulators at the first grid step ------------------
    @pl.when(pid == 0)
    def _():
        sconf_ref[...] = jnp.zeros_like(sconf_ref)
        sacc_ref[...] = jnp.zeros_like(sacc_ref)

    x = x_ref[...].astype(jnp.float32)          # (tile_n, C)
    t = t_ref[...]                              # (tile_n, 1) int32
    tn, c = x.shape

    # --- confidence / prediction (no full softmax needed) -------------------
    m = jnp.max(x, axis=1, keepdims=True)       # (tile_n, 1)
    if is_prob:
        conf = m
    else:
        s = jnp.sum(jnp.exp(x - m), axis=1, keepdims=True)
        conf = 1.0 / s                          # max softmax prob == 1 / sum(exp)

    col = jax.lax.broadcasted_iota(jnp.int32, x.shape, 1)
    # first index achieving the max (matches torch/jnp argmax tie-breaking)
    pred = jnp.min(jnp.where(x == m, col, jnp.int32(c)),
                   axis=1, keepdims=True)       # (tile_n, 1)
    acc = (pred == t).astype(jnp.float32)       # (tile_n, 1)

    # --- mask padded rows of the tail tile -----------------------------------
    row = pid * tile_n + jax.lax.broadcasted_iota(jnp.int32, (tn, 1), 0)
    valid = row < n_rows
    conf = jnp.where(valid, conf, 0.0)          # also scrubs any NaN/Inf garbage
    acc = jnp.where(valid, acc, 0.0)

    # --- lane-dense one-hot bin mask: (tile_n, nb_pad) -----------------------
    bidx = jax.lax.broadcasted_iota(jnp.int32, (1, nb_pad), 1)
    inv_nb = jnp.float32(1.0 / n_bins)
    real = bidx < n_bins
    lowers = jnp.where(real, bidx.astype(jnp.float32) * inv_nb, 2.0)
    uppers = jnp.where(real, (bidx + 1).astype(jnp.float32) * inv_nb, 3.0)
    in_bin = jnp.logical_and(conf > lowers, conf <= uppers).astype(jnp.float32)

    # --- two lane-dense axis-0 reductions, accumulated across the grid ------
    sconf_ref[...] += jnp.sum(conf * in_bin, axis=0, keepdims=True)
    sacc_ref[...] += jnp.sum(acc * in_bin, axis=0, keepdims=True)

    # --- finalize on the last grid step --------------------------------------
    @pl.when(pid == pl.num_programs(0) - 1)
    def _():
        # |avg_conf - avg_acc| * prop_in_bin == |sum_conf - sum_acc| / N,
        # and empty bins contribute exactly 0 (both sums are 0).
        diff = jnp.abs(sconf_ref[...] - sacc_ref[...])
        o_ref[...] = (jnp.sum(diff) / jnp.float32(n_rows)).reshape(1, 1)


def ece_loss(x: jax.Array, target: jax.Array, *, n_bins: int = 15,
             is_prob: bool = False, reduction: str = "mean",
             tile_n: int | None = None) -> jax.Array:
    """Pallas-backed ECE loss.  x: (N, C) logits/probs, target: (N,) int."""
    assert x.ndim == 2, f"Expected 2 dimensions (got {x.ndim})"
    n, c = x.shape
    t2d = target.astype(jnp.int32).reshape(n, 1)

    # Pick the largest row tile that keeps the pipelined logits buffer small
    # (~4 MiB per buffer, x2 for double buffering) and stays layout-legal.
    if tile_n is None:
        itemsize = jnp.dtype(x.dtype).itemsize
        budget = 4 * 1024 * 1024
        tile_n = max(8, min(2048, budget // max(1, c * itemsize)))
        tile_n = max(8, (tile_n // 8) * 8)
    if tile_n >= n:
        tile_n = n                      # single full-extent tile (always legal)

    grid = (pl.cdiv(n, tile_n),)
    nb_pad = ((n_bins + 127) // 128) * 128   # lane-dense bin axis

    kernel = functools.partial(
        _ece_kernel, n_bins=n_bins, n_rows=n, tile_n=tile_n,
        nb_pad=nb_pad, is_prob=is_prob)

    out = pl.pallas_call(
        kernel,
        out_shape=jax.ShapeDtypeStruct((1, 1), jnp.float32),
        grid_spec=pltpu.PrefetchScalarGridSpec(
            num_scalar_prefetch=0,
            grid=grid,
            in_specs=[
                pl.BlockSpec((tile_n, c), lambda i: (i, 0)),   # logits tile
                pl.BlockSpec((tile_n, 1), lambda i: (i, 0)),   # target tile
            ],
            out_specs=pl.BlockSpec((1, 1), lambda i: (0, 0)),  # resident scalar
            scratch_shapes=[
                pltpu.VMEM((1, nb_pad), jnp.float32),          # sum_conf per bin
                pltpu.VMEM((1, nb_pad), jnp.float32),          # sum_acc per bin
            ],
        ),
        compiler_params=pltpu.CompilerParams(
            dimension_semantics=("arbitrary",),
            vmem_limit_bytes=64 * 1024 * 1024,
        ),
    )(x, t2d)

    loss = out[0, 0]                    # loss tensor has a single element
    if reduction == "mean":
        return loss                     # mean of a 1-element tensor
    if reduction == "sum":
        return loss
    return loss.reshape(1)              # 'none'-style fallback


def _ece_reference(x, target, n_bins=15, is_prob=False):
    """Pure-JAX reference mirroring the PyTorch loop."""
    probs = x if is_prob else jax.nn.softmax(x, axis=1)
    conf = jnp.max(probs, axis=1)
    pred = jnp.argmax(probs, axis=1)
    acc = (pred == target).astype(jnp.float32)
    loss = jnp.float32(0.0)
    for i in range(n_bins):
        lo, hi = i / n_bins, (i + 1) / n_bins
        in_bin = (conf > lo) & (conf <= hi)
        cnt = jnp.sum(in_bin.astype(jnp.float32))
        prop = cnt / conf.shape[0]
        safe = jnp.maximum(cnt, 1.0)
        avg_conf = jnp.sum(conf * in_bin) / safe
        avg_acc = jnp.sum(acc * in_bin) / safe
        loss = loss + jnp.where(cnt > 0, jnp.abs(avg_conf - avg_acc) * prop, 0.0)
    return loss


if __name__ == "__main__":
    key = jax.random.PRNGKey(0)
    kx, kt = jax.random.split(key)

    # Small 2-D logits; N deliberately NOT divisible by tile_n to exercise the
    # grid + tail-tile masking path.
    N, C = 200, 32
    x = jax.random.normal(kx, (N, C), dtype=jnp.float32) * 3.0
    target = jax.random.randint(kt, (N,), 0, C, dtype=jnp.int32)

    out = ece_loss(x, target, n_bins=15, is_prob=False, reduction="mean",
                   tile_n=64)
    out = jax.block_until_ready(out)

    ref = _ece_reference(x, target, n_bins=15, is_prob=False)
    assert jnp.allclose(out, ref, atol=1e-5, rtol=1e-5), (out, ref)

    # Also check the probability-input path and the auto tile-size path.
    probs = jax.nn.softmax(x, axis=1)
    out_p = jax.block_until_ready(ece_loss(probs, target, is_prob=True))
    ref_p = _ece_reference(probs, target, is_prob=True)
    assert jnp.allclose(out_p, ref_p, atol=1e-5, rtol=1e-5), (out_p, ref_p)

    print("KERNEL_OK")
</pallas_src>

<mosaic_0001>
module attributes {stable_mosaic.version = 11 : i64} {
  func.func @_ece_kernel(%arg0: i32, %arg1: memref<64x32xf32, #tpu.memory_space<vmem>>, %arg2: memref<64x1xi32, #tpu.memory_space<vmem>>, %arg3: memref<1x1xf32, #tpu.memory_space<vmem>>, %arg4: memref<1x128xf32, #tpu.memory_space<vmem>>, %arg5: memref<1x128xf32, #tpu.memory_space<vmem>>) attributes {dimension_semantics = [#tpu.dimension_semantics<arbitrary>], iteration_bounds = array<i64: 4>, scalar_prefetch = 0 : i64, scratch_operands = 2 : i64, tpu.core_type = #tpu.core_type<tc>, window_params = [{transform_indices = @transform_0, window_bounds = array<i64: 64, 32>}, {transform_indices = @transform_1, window_bounds = array<i64: 64, 1>}, {pipeline_mode = #tpu.pipeline_mode<synchronous>, transform_indices = @transform_2, window_bounds = array<i64: 1, 1>}]} {
    %c0_i32 = arith.constant 0 : i32
    %0 = arith.cmpi eq, %arg0, %c0_i32 : i32
    %1 = arith.extui %0 : i1 to i32
    %c0_i32_0 = arith.constant 0 : i32
    %2 = arith.cmpi ne, %1, %c0_i32_0 : i32
    scf.if %2 {
      %cst_24 = arith.constant 0.000000e+00 : f32
      %75 = vector.broadcast %cst_24 : f32 to vector<1x128xf32>
      %c0_25 = arith.constant 0 : index
      %c0_26 = arith.constant 0 : index
      %76 = vector.load %arg4[%c0_25, %c0_26] : memref<1x128xf32, #tpu.memory_space<vmem>>, vector<1x128xf32>
      tpu.vector_store %arg4[%c0_25, %c0_26], %75 {strides = array<i32>} : memref<1x128xf32, #tpu.memory_space<vmem>>, vector<1x128xf32>,
      %cst_27 = arith.constant 0.000000e+00 : f32
      %77 = vector.broadcast %cst_27 : f32 to vector<1x128xf32>
      %c0_28 = arith.constant 0 : index
      %c0_29 = arith.constant 0 : index
      %78 = vector.load %arg5[%c0_28, %c0_29] : memref<1x128xf32, #tpu.memory_space<vmem>>, vector<1x128xf32>
      tpu.vector_store %arg5[%c0_28, %c0_29], %77 {strides = array<i32>} : memref<1x128xf32, #tpu.memory_space<vmem>>, vector<1x128xf32>,
    } else {
    }
    %c0 = arith.constant 0 : index
    %c0_1 = arith.constant 0 : index
    %3 = vector.load %arg1[%c0, %c0_1] : memref<64x32xf32, #tpu.memory_space<vmem>>, vector<64x32xf32>
    %c0_2 = arith.constant 0 : index
    %c0_3 = arith.constant 0 : index
    %4 = vector.load %arg2[%c0_2, %c0_3] : memref<64x1xi32, #tpu.memory_space<vmem>>, vector<64x1xi32>
    %cst = arith.constant dense<0xFF800000> : vector<64xf32>
    %5 = vector.multi_reduction <maximumf>, %3, %cst [1] : vector<64x32xf32> to vector<64xf32>
    %6 = vector.shape_cast %5 : vector<64xf32> to vector<64x1xf32>
    %7 = vector.broadcast %6 : vector<64x1xf32> to vector<64x32xf32>
    %8 = arith.subf %3, %7 : vector<64x32xf32>
    %9 = math.exp %8 : vector<64x32xf32>
    %cst_4 = arith.constant dense<0.000000e+00> : vector<64xf32>
    %10 = vector.multi_reduction <add>, %9, %cst_4 [1] : vector<64x32xf32> to vector<64xf32>
    %11 = vector.shape_cast %10 : vector<64xf32> to vector<64x1xf32>
    %cst_5 = arith.constant 1.000000e+00 : f32
    %12 = vector.broadcast %cst_5 : f32 to vector<64x1xf32>
    %13 = arith.divf %12, %11 : vector<64x1xf32>
    %14 = tpu.iota {dimensions = array<i32: 1>} : vector<64x32xi32>
    %15 = vector.broadcast %6 : vector<64x1xf32> to vector<64x32xf32>
    %16 = arith.cmpf oeq, %3, %15 : vector<64x32xf32>
    %c32_i32 = arith.constant 32 : i32
    %17 = vector.broadcast %c32_i32 : i32 to vector<64x32xi32>
    %18 = arith.select %16, %14, %17 : vector<64x32xi1>, vector<64x32xi32>
    %cst_6 = arith.constant dense<2147483647> : vector<64xi32>
    %19 = vector.multi_reduction <minsi>, %18, %cst_6 [1] : vector<64x32xi32> to vector<64xi32>
    %20 = vector.shape_cast %19 : vector<64xi32> to vector<64x1xi32>
    %21 = arith.cmpi eq, %20, %4 : vector<64x1xi32>
    %22 = arith.extui %21 : vector<64x1xi1> to vector<64x1xi32>
    %23 = arith.sitofp %22 : vector<64x1xi32> to vector<64x1xf32>
    %c64_i32 = arith.constant 64 : i32
    %24 = arith.muli %arg0, %c64_i32 : i32
    %25 = tpu.iota {dimensions = array<i32: 0>} : vector<64x1xi32>
    %26 = vector.broadcast %24 : i32 to vector<64x1xi32>
    %27 = arith.addi %26, %25 : vector<64x1xi32>
    %c200_i32 = arith.constant 200 : i32
    %28 = vector.broadcast %c200_i32 : i32 to vector<64x1xi32>
    %29 = arith.cmpi slt, %27, %28 : vector<64x1xi32>
    %cst_7 = arith.constant 0.000000e+00 : f32
    %30 = vector.broadcast %cst_7 : f32 to vector<64x1xf32>
    %31 = arith.select %29, %13, %30 : vector<64x1xi1>, vector<64x1xf32>
    %cst_8 = arith.constant 0.000000e+00 : f32
    %32 = vector.broadcast %cst_8 : f32 to vector<64x1xf32>
    %33 = arith.select %29, %23, %32 : vector<64x1xi1>, vector<64x1xf32>
    %34 = tpu.iota {dimensions = array<i32: 1>} : vector<1x128xi32>
    %c15_i32 = arith.constant 15 : i32
    %35 = vector.broadcast %c15_i32 : i32 to vector<1x128xi32>
    %36 = arith.cmpi slt, %34, %35 : vector<1x128xi32>
    %37 = arith.sitofp %34 : vector<1x128xi32> to vector<1x128xf32>
    %cst_9 = arith.constant 0.0666666701 : f32
    %38 = vector.broadcast %cst_9 : f32 to vector<1x128xf32>
    %39 = arith.mulf %37, %38 : vector<1x128xf32>
    %cst_10 = arith.constant 2.000000e+00 : f32
    %40 = vector.broadcast %cst_10 : f32 to vector<1x128xf32>
    %41 = arith.select %36, %39, %40 : vector<1x128xi1>, vector<1x128xf32>
    %c1_i32 = arith.constant 1 : i32
    %42 = vector.broadcast %c1_i32 : i32 to vector<1x128xi32>
    %43 = arith.addi %34, %42 : vector<1x128xi32>
    %44 = arith.sitofp %43 : vector<1x128xi32> to vector<1x128xf32>
    %cst_11 = arith.constant 0.0666666701 : f32
    %45 = vector.broadcast %cst_11 : f32 to vector<1x128xf32>
    %46 = arith.mulf %44, %45 : vector<1x128xf32>
    %cst_12 = arith.constant 3.000000e+00 : f32
    %47 = vector.broadcast %cst_12 : f32 to vector<1x128xf32>
    %48 = arith.select %36, %46, %47 : vector<1x128xi1>, vector<1x128xf32>
    %49 = vector.broadcast %31 : vector<64x1xf32> to vector<64x128xf32>
    %50 = vector.broadcast %41 : vector<1x128xf32> to vector<64x128xf32>
    %51 = arith.cmpf ogt, %49, %50 : vector<64x128xf32>
    %52 = vector.broadcast %31 : vector<64x1xf32> to vector<64x128xf32>
    %53 = vector.broadcast %48 : vector<1x128xf32> to vector<64x128xf32>
    %54 = arith.cmpf ole, %52, %53 : vector<64x128xf32>
    %55 = arith.andi %51, %54 : vector<64x128xi1>
    %56 = arith.extui %55 : vector<64x128xi1> to vector<64x128xi32>
    %57 = arith.sitofp %56 : vector<64x128xi32> to vector<64x128xf32>
    %c0_13 = arith.constant 0 : index
    %c0_14 = arith.constant 0 : index
    %58 = vector.load %arg4[%c0_13, %c0_14] : memref<1x128xf32, #tpu.memory_space<vmem>>, vector<1x128xf32>
    %59 = vector.broadcast %31 : vector<64x1xf32> to vector<64x128xf32>
    %60 = arith.mulf %59, %57 : vector<64x128xf32>
    %cst_15 = arith.constant dense<0.000000e+00> : vector<128xf32>
    %61 = vector.multi_reduction <add>, %60, %cst_15 [0] : vector<64x128xf32> to vector<128xf32>
    %62 = vector.shape_cast %61 : vector<128xf32> to vector<1x128xf32>
    %63 = arith.addf %58, %62 : vector<1x128xf32>
    %c0_16 = arith.constant 0 : index
    %c0_17 = arith.constant 0 : index
    %64 = vector.load %arg4[%c0_16, %c0_17] : memref<1x128xf32, #tpu.memory_space<vmem>>, vector<1x128xf32>
    tpu.vector_store %arg4[%c0_16, %c0_17], %63 {strides = array<i32>} : memref<1x128xf32, #tpu.memory_space<vmem>>, vector<1x128xf32>,
    %c0_18 = arith.constant 0 : index
    %c0_19 = arith.constant 0 : index
    %65 = vector.load %arg5[%c0_18, %c0_19] : memref<1x128xf32, #tpu.memory_space<vmem>>, vector<1x128xf32>
    %66 = vector.broadcast %33 : vector<64x1xf32> to vector<64x128xf32>
    %67 = arith.mulf %66, %57 : vector<64x128xf32>
    %cst_20 = arith.constant dense<0.000000e+00> : vector<128xf32>
    %68 = vector.multi_reduction <add>, %67, %cst_20 [0] : vector<64x128xf32> to vector<128xf32>
    %69 = vector.shape_cast %68 : vector<128xf32> to vector<1x128xf32>
    %70 = arith.addf %65, %69 : vector<1x128xf32>
    %c0_21 = arith.constant 0 : index
    %c0_22 = arith.constant 0 : index
    %71 = vector.load %arg5[%c0_21, %c0_22] : memref<1x128xf32, #tpu.memory_space<vmem>>, vector<1x128xf32>
    tpu.vector_store %arg5[%c0_21, %c0_22], %70 {strides = array<i32>} : memref<1x128xf32, #tpu.memory_space<vmem>>, vector<1x128xf32>,
    %c3_i32 = arith.constant 3 : i32
    %72 = arith.cmpi eq, %arg0, %c3_i32 : i32
    %73 = arith.extui %72 : i1 to i32
    %c0_i32_23 = arith.constant 0 : i32
    %74 = arith.cmpi ne, %73, %c0_i32_23 : i32
    scf.if %74 {
      %c0_24 = arith.constant 0 : index
      %c0_25 = arith.constant 0 : index
      %75 = vector.load %arg4[%c0_24, %c0_25] : memref<1x128xf32, #tpu.memory_space<vmem>>, vector<1x128xf32>
      %c0_26 = arith.constant 0 : index
      %c0_27 = arith.constant 0 : index
      %76 = vector.load %arg5[%c0_26, %c0_27] : memref<1x128xf32, #tpu.memory_space<vmem>>, vector<1x128xf32>
      %77 = arith.subf %75, %76 : vector<1x128xf32>
      %78 = math.absf %77 : vector<1x128xf32>
      %79 = vector.shape_cast %78 : vector<1x128xf32> to vector<1x1x128xf32>
      %cst_28 = arith.constant dense<0.000000e+00> : vector<1xf32>
      %80 = vector.multi_reduction <add>, %79, %cst_28 [1, 2] : vector<1x1x128xf32> to vector<1xf32>
      %81 = vector.shape_cast %80 : vector<1xf32> to vector<1x1x1xf32>
      %82 = vector.extract %81[0, 0, 0] : f32 from vector<1x1x1xf32>
      %cst_29 = arith.constant 2.000000e+02 : f32
      %83 = arith.divf %82, %cst_29 : f32
      %84 = vector.broadcast %83 : f32 to vector<1x1xf32>
      %c0_30 = arith.constant 0 : index
      %c0_31 = arith.constant 0 : index
      %85 = vector.load %arg3[%c0_30, %c0_31] : memref<1x1xf32, #tpu.memory_space<vmem>>, vector<1x1xf32>
      tpu.vector_store %arg3[%c0_30, %c0_31], %84 {strides = array<i32>} : memref<1x1xf32, #tpu.memory_space<vmem>>, vector<1x1xf32>,
    } else {
    }
    return
  }
  func.func @transform_0(%arg0: i32) -> (i32, i32) {
    %c0_i32 = arith.constant 0 : i32
    %c0_i32_0 = arith.constant 0 : i32
    return %arg0, %c0_i32 : i32, i32
  }
  func.func @transform_1(%arg0: i32) -> (i32, i32) {
    %c0_i32 = arith.constant 0 : i32
    %c0_i32_0 = arith.constant 0 : i32
    return %arg0, %c0_i32 : i32, i32
  }
  func.func @transform_2(%arg0: i32) -> (i32, i32) {
    %c0_i32 = arith.constant 0 : i32
    %c0_i32_0 = arith.constant 0 : i32
    %c0_i32_1 = arith.constant 0 : i32
    return %c0_i32, %c0_i32_0 : i32, i32
  }
}

</mosaic_0001>

<bundles_post_ra>
// kernel: tpu_custom_call.1
= control target key start
LH: loop header
LB: loop body
LE: loop exit
PB: predicated region body
PF: predicated region fallthrough
CT: control target
= control target key end

     0   :  { %7 = vsyncpa [#allocation5], 0  ;;  %s1012_s9 = smov 0   ;;  %s1632_s0 = inlined_call_operand.vmem [shape: f32[200,32], index: 0, kind: input, shape index: {}]   ;;  %s1633_s1 = inlined_call_operand.vmem [shape: s32[200,1], index: 1, kind: input, shape index: {}]   ;;  %s1634_s2 = inlined_call_operand.hbm [shape: f32[1,1], index: 2, kind: output, shape index: {}]  }
   0x1 LB: > { %s1018_s10 = sadd.s32 4294967295, %s990_s9   ;;  %p844_p0 = scmp.ge.s32.totalorder %s990_s9, 1  ;;  %s990_s9 = sphi %s1012_s9, %s13_s9  }
   0x2   : > { %p136_p1 = scmp.lt.s32.totalorder %s990_s9, 5 }
   0x4   : > { %p137_p2 = pnand %p844_p0, %p136_p1 }
   0x5   : > { %s845_s11 = sshll.u32 (!%p137_p2), %s1018_s10, 3  ;;  %p849_p4 = scmp.ne.s32.totalorder (!%p137_p2), %s1018_s10, 0 }
   0x6   : > { %140 = sbr.rel (%p137_p2) target bundleno = 746 (0x2ea), region = 28  ;;  %p171_p3 = scmp.lt.s32.totalorder (!%p137_p2), %s845_s11, 24 }
   0xb   : > { %s1662_s11 = smov (!%p171_p3, %s845_s11), 24  ;;  %197 = sbr.rel (%p849_p4) target bundleno = 19 (0x13), region = 32 }
   0xc   : > { %s846_s12 = sshll.u32 %s1662_s11, 3 }
   0xd   : > { %s174_s15 = scalar_lea.vmem %s1632_s0, %s846_s12  ;;  %s1029_s18 = scalar_lea.vmem %s1633_s1, %s846_s12 }
  0x10   : > { %v992_v0 = vmov 0.0  }
  0x11   : > { %198 = vst [vmem:[#allocation2] sm:$0x1] %v992_v0 }
  0x12   : > { %199 = vst [vmem:[#allocation3] sm:$0x1] %v992_v0 }
  0x13 PF: > { %v1032_v1 = vld [vmem:[%s174_s15 + $0x20] sm:$0xff]  ;;  %vm216_vm0 = vcmask 261120   ;;  %v1034_v2 = vld [vmem:[%s174_s15 + $0x10] sm:$0xff]  ;;  %v1044_v7 = vld [vmem:[%s174_s15 + $0x28] sm:$0xff]  ;;  %v409_v17 = vlaneseq  ;;  %s858_s19 = sshll.u32 %s1018_s10, 6  ;;  %p867_p5 = scmp.ne.s32.totalorder %s1018_s10, 3 }
  0x14   : > { %v1036_v3 = vld [vmem:[%s174_s15] sm:$0xff]  ;;  %v229_v4 = vsel %vm216_vm0, %v1032_v1, -inf  ;;  %v223_v5 = vsel %vm216_vm0, %v1034_v2, -inf  ;;  %v1046_v8 = vld [vmem:[%s174_s15 + $0x18] sm:$0xff]  ;;  %v201_v9 = vld [vmem:[%s174_s15 + $0x8] sm:$0xff]  ;;  %v232_v10 = vsel %vm216_vm0, %v1044_v7, -inf }
  0x15   : > { %v217_v6 = vsel %vm216_vm0, %v1036_v3, -inf  ;;  %230 = vmax.xlane.f32.xlu2 %v229_v4  ;;  %224 = vmax.xlane.f32.xlu1 %v223_v5  ;;  %v226_v11 = vsel %vm216_vm0, %v1046_v8, -inf  ;;  %v220_v12 = vsel %vm216_vm0, %v201_v9, -inf  ;;  %v1053_v13 = vld [vmem:[%s174_s15 + $0x38] sm:$0xff]  ;;  %v1055_v14 = vld [vmem:[%s174_s15 + $0x30] sm:$0xff]  ;;  %v1062_v18 = vand.u32 127, %v409_v17 }
  0x16   : > { %218 = vmax.xlane.f32.xlu0 %v217_v6  ;;  %v238_v15 = vsel %vm216_vm0, %v1053_v13, -inf  ;;  %v235_v16 = vsel %vm216_vm0, %v1055_v14, -inf }
  0x1d   : > { %233 = vmax.xlane.f32.xlu2 %v232_v10  ;;  %227 = vmax.xlane.f32.xlu1 %v226_v11 }
  0x1e   : > { %221 = vmax.xlane.f32.xlu0 %v220_v12 }
  0x25   : > { %239 = vmax.xlane.f32.xlu1 %v238_v15 }
  0x26   : > { %236 = vmax.xlane.f32.xlu0 %v235_v16 }
  0x88   : > { %v231_v19 = vpop.xlane.xlu2 %230  ;;  %v225_v20 = vpop.xlane.xlu1 %224 }
  0x89   : > { %vm413_vm1 = vcmp.eq.f32.partialorder %v1034_v2, %v225_v20  ;;  %v1065_v21 = vpop.xlane.xlu0 %218  ;;  %vm415_vm6 = vcmp.eq.f32.partialorder %v1032_v1, %v231_v19  ;;  %v245_v45 = vsub.f32 %v1032_v1, %v231_v19  ;;  %v243_v48 = vsub.f32 %v1034_v2, %v225_v20 }
  0x8a   : > { %v421_v22 = vsel %vm413_vm1, %v1062_v18, 32  ;;  %vm411_vm2 = vcmp.eq.f32.partialorder %v1036_v3, %v1065_v21  ;;  %v423_v43 = vsel %vm415_vm6, %v1062_v18, 32  ;;  %v241_v61 = vsub.f32 %v1036_v3, %v1065_v21 }
  0x8b   : > { %v419_v23 = vsel %vm411_vm2, %v1062_v18, 32  ;;  %v1072_v24 = vsel %vm216_vm0, %v421_v22, 2147483647  ;;  %v1121_v52 = vsel %vm216_vm0, %v423_v43, 2147483647 }
  0x8c   : > { %v1075_v25 = vsel %vm216_vm0, %v419_v23, 2147483647  ;;  %v459_v26 = vshra.s32 %v1072_v24, 16  ;;  %v257_v53 = vmul.f32 1.442695, %v245_v45  ;;  %v489_v57 = vshra.s32 %v1121_v52, 16 }
  0x8d   : > { %v429_v27 = vshra.s32 %v1075_v25, 16  ;;  %v253_v55 = vmul.f32 1.442695, %v243_v48  ;;  %v249_v3 = vmul.f32 1.442695, %v241_v61 }
  0x8e   : > { %v1079_v28 = vcvt.s32.f32 %v459_v26  ;;  %v1141_v1 = vcvt.s32.f32 %v489_v57 }
  0x8f   : > { %v1081_v29 = vcvt.s32.f32 %v429_v27 }
  0x90   : > { %v234_v30 = vpop.xlane.xlu2 %233  ;;  %v1083_v31 = vpop.xlane.xlu1 %227  ;;  %462 = vmin.xlane.f32.xlu1 %v1079_v28 }
  0x91   : > { %vm416_vm3 = vcmp.eq.f32.partialorder %v1044_v7, %v234_v30  ;;  %vm414_vm4 = vcmp.eq.f32.partialorder %v1046_v8, %v1083_v31  ;;  %v222_v32 = vpop.xlane.xlu0 %221  ;;  %432 = vmin.xlane.f32.xlu2 %v1081_v29  ;;  %v246_v0 = vsub.f32 %v1044_v7, %v234_v30  ;;  %v244_v7 = vsub.f32 %v1046_v8, %v1083_v31 }
  0x92   : > { %v424_v33 = vsel %vm416_vm3, %v1062_v18, 32  ;;  %v422_v34 = vsel %vm414_vm4, %v1062_v18, 32  ;;  %v242_v35 = vsub.f32 %v201_v9, %v222_v32  ;;  %vm412_vm5 = vcmp.eq.f32.partialorder %v201_v9, %v222_v32 }
  0x93   : > { %v420_v36 = vsel %vm412_vm5, %v1062_v18, 32  ;;  %v1095_v38 = vsel %vm216_vm0, %v424_v33, 2147483647  ;;  %v1098_v39 = vsel %vm216_vm0, %v422_v34, 2147483647  ;;  %v458_v31 = vand.u32 65535, %v1072_v24 }
  0x94   : > { %v251_v37 = vmul.f32 1.442695, %v242_v35  ;;  %v504_v40 = vshra.s32 %v1095_v38, 16  ;;  %v474_v41 = vshra.s32 %v1098_v39, 16  ;;  %v1103_v42 = vsel %vm216_vm0, %v420_v36, 2147483647 }
  0x95   : > { %v444_v44 = vshra.s32 %v1103_v42, 16  ;;  %v259_v5 = vmul.f32 1.442695, %v246_v0  ;;  %v255_v15 = vmul.f32 1.442695, %v244_v7  ;;  %v460_v33 = vcvt.s32.f32 %v458_v31 }
  0x96   : > { %918 = vpow2.f32 %v251_v37  ;;  %v1108_v46 = vcvt.s32.f32 %v504_v40  ;;  %v1110_v47 = vcvt.s32.f32 %v474_v41  ;;  %v503_v24 = vand.u32 65535, %v1095_v38 }
  0x97   : > { %v1113_v49 = vcvt.s32.f32 %v444_v44  ;;  %920 = vpow2.f32 %v257_v53  ;;  %v443_v40 = vand.u32 65535, %v1103_v42 }
  0x98   : > { %v1115_v50 = vpop.xlane.xlu1 %239  ;;  %507 = vmin.xlane.f32.xlu1 %v1108_v46  ;;  %922 = vpow2.f32 %v253_v55  ;;  %v505_v43 = vcvt.s32.f32 %v503_v24 }
  0x99   : > { %v237_v51 = vpop.xlane.xlu0 %236  ;;  %vm418_vm7 = vcmp.eq.f32.partialorder %v1053_v13, %v1115_v50  ;;  %477 = vmin.xlane.f32.xlu2 %v1110_v47  ;;  %447 = vmin.xlane.f32.xlu0 %v1113_v49  ;;  %924 = vpow2.f32 %v249_v3  ;;  %v615_v3 = vcvt.s32.f32 %v1062_v18 }
  0x9a   : > { %vm417_vm8 = vcmp.eq.f32.partialorder %v1055_v14, %v237_v51  ;;  %v426_v56 = vsel %vm418_vm7, %v1062_v18, 32  ;;  %926 = vpow2.f32 %v259_v5  ;;  %v247_v20 = vsub.f32 %v1055_v14, %v237_v51 }
  0x9b   : > { %v425_v54 = vsel %vm417_vm8, %v1062_v18, 32  ;;  %v1138_v63 = vsel %vm216_vm0, %v426_v56, 2147483647  ;;  %928 = vpow2.f32 %v255_v15  ;;  %v428_v14 = vand.u32 65535, %v1075_v25 }
  0x9c   : > { %v1130_v58 = vsel %vm216_vm0, %v425_v54, 2147483647  ;;  %v919_v59 = vpop.eup %918  ;;  %v534_v4 = vshra.s32 %v1138_v63, 16  ;;  %v261_v23 = vmul.f32 1.442695, %v247_v20  ;;  %v473_v25 = vand.u32 65535, %v1098_v39 }
  0x9d   : > { %v519_v60 = vshra.s32 %v1130_v58, 16  ;;  %v268_v2 = vsel %vm216_vm0, %v919_v59, 0.0  ;;  %v921_v6 = vpop.eup %920  ;;  %v430_v35 = vcvt.s32.f32 %v428_v14  ;;  %v445_v39 = vcvt.s32.f32 %v443_v40 }
  0x9e   : > { %v923_v9 = vpop.eup %922  ;;  %v1147_v10 = vcvt.s32.f32 %v534_v4  ;;  %v277_v11 = vsel %vm216_vm0, %v921_v6, 0.0  ;;  %930 = vpow2.f32 %v261_v23  ;;  %v518_v51 = vand.u32 65535, %v1130_v58 }
  0x9f   : > { %v1135_v62 = vcvt.s32.f32 %v519_v60  ;;  %v271_v12 = vsel %vm216_vm0, %v923_v9, 0.0  ;;  %v925_v16 = vpop.eup %924  ;;  %v616_v15 = vmul.f32 0.06666667, %v615_v3 }
  0xa0   : > { %269 = vadd.xlane.f32.xlu1 %v268_v2  ;;  %v927_v19 = vpop.eup %926  ;;  %v265_v21 = vsel %vm216_vm0, %v925_v16, 0.0  ;;  %v1214_v2 = vshrl.u32 %v409_v17, 7 }
  0xa1   : > { %492 = vmin.xlane.f32.xlu0 %v1141_v1  ;;  %522 = vmin.xlane.f32.xlu2 %v1135_v62  ;;  %v280_v22 = vsel %vm216_vm0, %v927_v19, 0.0  ;;  %v929_v8 = vpop.eup %928 }
  0xa2   : > { %v274_v26 = vsel %vm216_vm0, %v929_v8, 0.0  ;;  %v574_v17 = vadd.s32 8, %v1214_v2 }
  0xa4   : > { %v931_v27 = vpop.eup %930 }
  0xa5   : > { %v283_v30 = vsel %vm216_vm0, %v931_v27, 0.0 }
  0xa8   : > { %278 = vadd.xlane.f32.xlu1 %v277_v11 }
  0xa9   : > { %537 = vmin.xlane.f32.xlu0 %v1147_v10  ;;  %272 = vadd.xlane.f32.xlu2 %v271_v12  ;;  %v1230_v12 = vstv %s858_s19 }
  0xaa   : > { %v1244_v27 = vadd.s32 %v1230_v12, %v574_v17 }
  0xac   : > { %vm591_vm5 = vcmp.lt.s32.totalorder %v1244_v27, 200 }
  0xb1   : > { %266 = vadd.xlane.f32.xlu0 %v265_v21  ;;  %281 = vadd.xlane.f32.xlu2 %v280_v22 }
  0xb9   : > { %275 = vadd.xlane.f32.xlu0 %v274_v26 }
  0xc1   : > { %284 = vadd.xlane.f32.xlu0 %v283_v30  ;;  %v575_v30 = vadd.s32 16, %v1214_v2 }
 0x103   : > { %v1161_v32 = vpop.xlane.xlu1 %462 }
 0x104   : > { %v1163_v34 = vpop.xlane.xlu2 %432  ;;  %vm464_vm9 = vcmp.eq.f32.partialorder %v1079_v28, %v1161_v32  ;;  %v475_v28 = vcvt.s32.f32 %v473_v25  ;;  %v993_v25 = vmov 0  }
 0x105   : > { %vm434_vm10 = vcmp.eq.f32.partialorder %v1081_v29, %v1163_v34  ;;  %v465_v36 = vsel %vm464_vm9, %v460_v33, inf  ;;  %v248_v29 = vsub.f32 %v1053_v13, %v1115_v50  ;;  %v439_v7 = vcvt.f32.s32 %v1163_v34  ;;  %901 = vset.pattern.permute.xlu0 %v993_v25  ;;  %895 = vset.pattern.permute.xlu2 %v993_v25 }
 0x106   : > { %v435_v37 = vsel %vm434_vm10, %v430_v35, inf  ;;  %466 = vmin.xlane.f32.xlu0 %v465_v36  ;;  %v577_v35 = vadd.s32 32, %v1214_v2  ;;  %907 = vset.pattern.permute.xlu1 %v993_v25 }
 0x107   : > { %436 = vmin.xlane.f32.xlu1 %v435_v37  ;;  %v263_v53 = vmul.f32 1.442695, %v248_v29  ;;  %v1240_v8 = vshll.u32 %v439_v7, 16 }
 0x109   : > { %932 = vpow2.f32 %v263_v53 }
 0x10b   : > { %v1172_v41 = vpop.xlane.xlu1 %507 }
 0x10c   : > { %v1174_v44 = vpop.xlane.xlu2 %477  ;;  %v1176_v45 = vpop.xlane.xlu0 %447  ;;  %vm509_vm11 = vcmp.eq.f32.partialorder %v1108_v46, %v1172_v41  ;;  %v488_v46 = vand.u32 65535, %v1121_v52  ;;  %v533_v52 = vand.u32 65535, %v1138_v63  ;;  %v618_v63 = vadd.s32 1, %v1062_v18 }
 0x10d   : > { %vm479_vm12 = vcmp.eq.f32.partialorder %v1110_v47, %v1174_v44  ;;  %v510_v38 = vsel %vm509_vm11, %v505_v43, inf  ;;  %vm449_vm13 = vcmp.eq.f32.partialorder %v1113_v49, %v1176_v45  ;;  %v520_v47 = vcvt.s32.f32 %v518_v51 }
 0x10e   : > { %v480_v42 = vsel %vm479_vm12, %v475_v28, inf  ;;  %511 = vmin.xlane.f32.xlu0 %v510_v38  ;;  %v450_v48 = vsel %vm449_vm13, %v445_v39, inf  ;;  %v490_v50 = vcvt.s32.f32 %v488_v46  ;;  %v535_v59 = vcvt.s32.f32 %v533_v52 }
 0x10f   : > { %481 = vmin.xlane.f32.xlu1 %v480_v42  ;;  %451 = vmin.xlane.f32.xlu2 %v450_v48  ;;  %v933_v56 = vpop.eup %932  ;;  %v619_v5 = vcvt.s32.f32 %v618_v63  ;;  %v514_v11 = vcvt.f32.s32 %v1172_v41  ;;  %v484_v22 = vcvt.f32.s32 %v1174_v44  ;;  %v454_v26 = vcvt.f32.s32 %v1176_v45 }
 0x110   : > { %v286_v58 = vsel %vm216_vm0, %v933_v56, 0.0  ;;  %vm614_vm0 = vcmp.lt.s32.totalorder %v1062_v18, 15  ;;  %v1274_v28 = vadd.s32 %v1230_v12, %v575_v30  ;;  %v578_v42 = vadd.s32 40, %v1214_v2 }
 0x111   : > { %v620_v16 = vmul.f32 0.06666667, %v619_v5  ;;  %v1247_v31 = vshll.u32 %v514_v11, 16  ;;  %v1251_v14 = vsel %vm614_vm0, %v616_v15, 2.0  ;;  %v1260_v36 = vshll.u32 %v484_v22, 16 }
 0x112   : > { %v1265_v40 = vshll.u32 %v454_v26, 16  ;;  %v1284_v51 = vadd.s32 %v1230_v12, %v577_v35  ;;  %vm592_vm13 = vcmp.lt.s32.totalorder %v1274_v28, 200 }
 0x113   : > { %v1202_v61 = vpop.xlane.xlu1 %269 }
 0x114   : > { %v1188_v54 = vpop.xlane.xlu2 %522  ;;  %v1190_v13 = vpop.xlane.xlu0 %492  ;;  %934 = vrcp.f32 %v1202_v61  ;;  %v313_v37 = vand.u32 2147483647, %v1202_v61  ;;  %v315_v41 = vand.u32 2147483648, %v1202_v61  ;;  %vm309_vm2 = vweird.f32 %v1202_v61 }
 0x115   : > { %vm524_vm14 = vcmp.eq.f32.partialorder %v1135_v62, %v1188_v54  ;;  %vm494_vm15 = vcmp.eq.f32.partialorder %v1141_v1, %v1190_v13  ;;  %v529_v43 = vcvt.f32.s32 %v1188_v54  ;;  %v499_v29 = vcvt.f32.s32 %v1190_v13 }
 0x116   : > { %v525_v49 = vsel %vm524_vm14, %v520_v47, inf  ;;  %v495_v55 = vsel %vm494_vm15, %v490_v50, inf  ;;  %vm1286_vm4 = vcmp.eq.f32.partialorder %v313_v37, 8.507059e+37  ;;  %v316_v47 = vor.u32 1.1754944e-38, %v315_v41 }
 0x117   : > { %526 = vmin.xlane.f32.xlu1 %v525_v49  ;;  %496 = vmin.xlane.f32.xlu2 %v495_v55  ;;  %v1295_v50 = vshll.u32 %v529_v43, 16  ;;  %v1299_v49 = vadd.s32 %v1230_v12, %v1214_v2  ;;  %v576_v55 = vadd.s32 24, %v1214_v2  ;;  %v1306_v56 = vshll.u32 %v499_v29, 16 }
 0x119   : > { %vm590_vm10 = vcmp.lt.s32.totalorder %v1299_v49, 200 }
 0x11a   : > { %v1208_v0 = vpop.eup %934 }
 0x11b   : > { %v1216_v4 = vpop.xlane.xlu1 %278  ;;  %v305_v6 = vmul.f32 %v1208_v0, %v1202_v61  ;;  %vm310_vm3 = vweird.f32 %v1208_v0 }
 0x11c   : > { %v1197_v57 = vpop.xlane.xlu0 %537  ;;  %v1210_v1 = vpop.xlane.xlu2 %272  ;;  %v360_v53 = vand.u32 2147483648, %v1216_v4  ;;  %vm1302_vm6 = vmor %vm309_vm2, %vm310_vm3  ;;  %v358_v61 = vand.u32 2147483647, %v1216_v4  ;;  %vm354_vm8 = vweird.f32 %v1216_v4 }
 0x11d   : > { %vm539_vm1 = vcmp.eq.f32.partialorder %v1147_v10, %v1197_v57  ;;  %v469_v10 = vcvt.f32.s32 %v1161_v32  ;;  %v306_v20 = vsub.f32 1.0, %v305_v6  ;;  %v1253_v32 = vsel %vm614_vm0, %v620_v16, 3.0 }
 0x11e   : > { %v540_v60 = vsel %vm539_vm1, %v535_v59, inf  ;;  %vm324_vm7 = vweird.f32 %v1210_v1  ;;  %v328_v63 = vand.u32 2147483647, %v1210_v1  ;;  %v1319_v5 = vor.u32 1.1754944e-38, %v360_v53 }
 0x11f   : > { %287 = vadd.xlane.f32.xlu1 %v286_v58  ;;  %541 = vmin.xlane.f32.xlu2 %v540_v60  ;;  %v1235_v21 = vshll.u32 %v469_v10, 16  ;;  %v307_v34 = vmul.f32 %v1208_v0, %v306_v20  ;;  %v1310_v60 = vadd.s32 %v1230_v12, %v578_v42  ;;  %v330_v10 = vand.u32 2147483648, %v1210_v1 }
 0x120   : > { %v544_v17 = vcvt.f32.s32 %v1197_v57  ;;  %vm1345_vm14 = vcmp.eq.f32.partialorder %v328_v63, 8.507059e+37 }
 0x121   : > { %v308_v48 = vadd.f32 %v1208_v0, %v307_v34  ;;  %v331_v41 = vor.u32 1.1754944e-38, %v330_v10 }
 0x122   : > { %v1349_v43 = vshll.u32 %v544_v17, 16 }
 0x123   : > { %v312_v3 = vsel %vm1302_vm6, %v1208_v0, %v308_v48  ;;  %v1330_v0 = vadd.s32 %v1230_v12, %v576_v55 }
 0x124   : > { %v1204_v62 = vpop.xlane.xlu0 %266  ;;  %v1269_v44 = vpop.xlane.xlu2 %281  ;;  %v317_v57 = vsel %vm1286_vm4, %v316_v47, %v312_v3  ;;  %v208_v3 = vld [vmem:[%s1029_s18] sm:$0xff] }
 0x125   : > { %936 = vrcp.f32 %v1204_v62  ;;  %v375_v26 = vand.u32 2147483648, %v1269_v44  ;;  %vm294_vm12 = vweird.f32 %v1204_v62  ;;  %v300_v30 = vand.u32 2147483648, %v1204_v62 }
 0x126   : > { %938 = vrcp.f32 %v1210_v1  ;;  %v298_v35 = vand.u32 2147483647, %v1204_v62  ;;  %v1382_v55 = vsel %vm591_vm5, %v317_v57, 0.0  ;;  %vm593_vm3 = vcmp.lt.s32.totalorder %v1330_v0, 200 }
 0x127   : > { %940 = vrcp.f32 %v1216_v4  ;;  %v1377_v53 = vor.u32 1.1754944e-38, %v375_v26 }
 0x128   : > { %vm299_vm2 = vcmp.eq.f32.partialorder %v298_v35, 8.507059e+37  ;;  %v209_v35 = vld [vmem:[%s1029_s18 + $0x8] sm:$0xff] }
 0x12b   : > { %v1232_v19 = vpop.eup %936 }
 0x12c   : > { %v1222_v9 = vpop.xlane.xlu0 %275  ;;  %v1238_v23 = vpop.eup %938  ;;  %v290_v18 = vmul.f32 %v1232_v19, %v1204_v62  ;;  %vm295_vm11 = vweird.f32 %v1232_v19 }
 0x12d   : > { %v1255_v33 = vpop.eup %940  ;;  %942 = vrcp.f32 %v1222_v9  ;;  %v320_v24 = vmul.f32 %v1238_v23, %v1210_v1  ;;  %vm325_vm9 = vweird.f32 %v1238_v23  ;;  %vm1355_vm15 = vmor %vm294_vm12, %vm295_vm11  ;;  %v343_v63 = vand.u32 2147483647, %v1222_v9 }
 0x12e   : > { %v350_v38 = vmul.f32 %v1255_v33, %v1216_v4  ;;  %v291_v39 = vsub.f32 1.0, %v290_v18  ;;  %944 = vrcp.f32 %v1269_v44  ;;  %vm355_vm1 = vweird.f32 %v1255_v33  ;;  %vm1373_vm0 = vmor %vm324_vm7, %vm325_vm9 }
 0x12f   : > { %v321_v54 = vsub.f32 1.0, %v320_v24  ;;  %vm1395_vm4 = vmor %vm354_vm8, %vm355_vm1  ;;  %vm339_vm6 = vweird.f32 %v1222_v9  ;;  %vm1412_vm7 = vcmp.eq.f32.partialorder %v358_v61, 8.507059e+37  ;;  %vm623_vm12 = vcmp.gt.f32.partialorder %v1382_v55, %v1251_v14 }
 0x130   : > { %v351_v58 = vsub.f32 1.0, %v350_v38  ;;  %v292_v59 = vmul.f32 %v1232_v19, %v291_v39  ;;  %v373_v39 = vand.u32 2147483647, %v1269_v44  ;;  %vm1429_vm1 = vcmp.eq.f32.partialorder %v343_v63, 8.507059e+37 }
 0x131   : > { %v322_v6 = vmul.f32 %v1238_v23, %v321_v54  ;;  %v301_v54 = vor.u32 1.1754944e-38, %v300_v30  ;;  %v211_v30 = vld [vmem:[%s1029_s18 + $0x18] sm:$0xff] }
 0x132   : > { %v352_v16 = vmul.f32 %v1255_v33, %v351_v58  ;;  %v293_v20 = vadd.f32 %v1232_v19, %v292_v59  ;;  %v210_v58 = vld [vmem:[%s1029_s18 + $0x10] sm:$0xff] }
 0x133   : > { %v1293_v13 = vpop.eup %942  ;;  %v323_v34 = vadd.f32 %v1238_v23, %v322_v6  ;;  %v579_v6 = vadd.s32 48, %v1214_v2 }
 0x134   : > { %v1271_v45 = vpop.xlane.xlu0 %284  ;;  %v335_v7 = vmul.f32 %v1293_v13, %v1222_v9  ;;  %v1332_v15 = vpop.eup %944  ;;  %v1360_v62 = vadd.f32 %v1255_v33, %v352_v16  ;;  %v297_v42 = vsel %vm1355_vm15, %v1232_v19, %v293_v20  ;;  %vm340_vm8 = vweird.f32 %v1293_v13 }
 0x135   : > { %946 = vrcp.f32 %v1271_v45  ;;  %v365_v29 = vmul.f32 %v1332_v15, %v1269_v44  ;;  %v327_v1 = vsel %vm1373_vm0, %v1238_v23, %v323_v34  ;;  %v345_v23 = vand.u32 2147483648, %v1222_v9 }
 0x136   : > { %v336_v37 = vsub.f32 1.0, %v335_v7  ;;  %v332_v57 = vsel %vm1345_vm14, %v331_v41, %v327_v1  ;;  %vm369_vm15 = vweird.f32 %v1269_v44  ;;  %v994_v41 = vmov 0.0   ;;  %vm1442_vm14 = vmor %vm339_vm6, %vm340_vm8  ;;  %v213_v1 = vld [vmem:[%s1029_s18 + $0x28] sm:$0xff] }
 0x137   : > { %v366_v59 = vsub.f32 1.0, %v365_v29  ;;  %v1485_v49 = vadd.s32 %v1230_v12, %v579_v6  ;;  %v388_v16 = vand.u32 2147483647, %v1271_v45  ;;  %v390_v44 = vand.u32 2147483648, %v1271_v45 }
 0x138   : > { %v337_v19 = vmul.f32 %v1293_v13, %v336_v37 }
 0x139   : > { %v367_v61 = vmul.f32 %v1332_v15, %v366_v59 }
 0x13a   : > { %v338_v26 = vadd.f32 %v1293_v13, %v337_v19 }
 0x13b   : > { %v1367_v48 = vpop.eup %946  ;;  %v368_v59 = vadd.f32 %v1332_v15, %v367_v61 }
 0x13c   : > { %v380_v10 = vmul.f32 %v1367_v48, %v1271_v45 }
 0x13e   : > { %v381_v25 = vsub.f32 1.0, %v380_v10  ;;  %v212_v10 = vld [vmem:[%s1029_s18 + $0x20] sm:$0xff] }
 0x179   : > { %v467_v11 = vpop.xlane.xlu0 %466 }
 0x17a   : > { %v437_v22 = vpop.xlane.xlu1 %436  ;;  %v468_v18 = vcvt.f32.s32 %v467_v11  ;;  %v357_v11 = vsel %vm1395_vm4, %v1255_v33, %v1360_v62 }
 0x17b   : > { %v438_v24 = vcvt.f32.s32 %v437_v22  ;;  %v362_v27 = vsel %vm1412_vm7, %v1319_v5, %v357_v11 }
 0x17c   : > { %v471_v47 = vadd.s32 %v1235_v21, %v468_v18  ;;  %v391_v18 = vor.u32 1.1754944e-38, %v390_v44 }
 0x17d   : > { %v441_v52 = vadd.s32 %v1240_v8, %v438_v24  ;;  %v302_v8 = vsel %vm299_vm2, %v301_v54, %v297_v42  ;;  %v346_v24 = vor.u32 1.1754944e-38, %v345_v23  ;;  %vm594_vm2 = vcmp.lt.s32.totalorder %v1284_v51, 200 }
 0x17e   : > { %vm549_vm9 = vcmp.eq.s32.totalorder %v471_v47, %v210_v58  ;;  %v1423_v4 = vsel %vm590_vm10, %v302_v8, 0.0  ;;  %v342_v42 = vsel %vm1442_vm14, %v1293_v13, %v338_v26  ;;  %v382_v58 = vmul.f32 %v1367_v48, %v381_v25 }
 0x17f   : > { %vm547_vm11 = vcmp.eq.s32.totalorder %v441_v52, %v208_v3  ;;  %v852_v29 = vsel %vm549_vm9, 1.0, %v994_v41  ;;  %vm622_vm4 = vcmp.gt.f32.partialorder %v1423_v4, %v1251_v14  ;;  %vm630_vm8 = vcmp.le.f32.partialorder %v1423_v4, %v1253_v32 }
 0x180   : > { %v608_v47 = vsel %vm592_vm13, %v852_v29, 0.0  ;;  %vm1469_vm9 = vcmp.eq.f32.partialorder %v373_v39, 8.507059e+37  ;;  %v347_v3 = vsel %vm1429_vm1, %v346_v24, %v342_v42  ;;  %vm1499_vm1 = vmand %vm622_vm4, %vm630_vm8  ;;  %vm385_vm4 = vweird.f32 %v1367_v48 }
 0x181   : > { %v512_v17 = vpop.xlane.xlu0 %511  ;;  %v601_v11 = vsel %vm593_vm3, %v347_v3, 0.0 }
 0x182   : > { %v482_v7 = vpop.xlane.xlu1 %481  ;;  %v452_v22 = vpop.xlane.xlu2 %451  ;;  %v513_v37 = vcvt.f32.s32 %v512_v17 }
 0x183   : > { %v483_v20 = vcvt.f32.s32 %v482_v7  ;;  %v453_v33 = vcvt.f32.s32 %v452_v22  ;;  %v383_v7 = vadd.f32 %v1367_v48, %v382_v58 }
 0x184   : > { %v516_v54 = vadd.s32 %v1247_v31, %v513_v37 }
 0x185   : > { %v486_v34 = vadd.s32 %v1260_v36, %v483_v20  ;;  %v456_v38 = vadd.s32 %v1265_v40, %v453_v33  ;;  %v850_v36 = vsel %vm547_vm11, 1.0, %v994_v41  ;;  %v1453_v40 = vsel %vm592_vm13, %v332_v57, 0.0 }
 0x186   : > { %v606_v21 = vsel %vm590_vm10, %v850_v36, 0.0  ;;  %vm595_vm13 = vcmp.lt.s32.totalorder %v1310_v60, 200  ;;  %vm370_vm11 = vweird.f32 %v1332_v15  ;;  %vm552_vm10 = vcmp.eq.s32.totalorder %v516_v54, %v213_v1 }
 0x187   : > { %vm550_vm0 = vcmp.eq.s32.totalorder %v486_v34, %v211_v30  ;;  %vm548_vm6 = vcmp.eq.s32.totalorder %v456_v38, %v209_v35  ;;  %vm624_vm14 = vcmp.gt.f32.partialorder %v1453_v40, %v1251_v14  ;;  %vm632_vm7 = vcmp.le.f32.partialorder %v1453_v40, %v1253_v32  ;;  %v215_v38 = vld [vmem:[%s1029_s18 + $0x38] sm:$0xff] }
 0x188   : > { %v853_v9 = vsel %vm550_vm0, 1.0, %v994_v41  ;;  %v851_v46 = vsel %vm548_vm6, 1.0, %v994_v41  ;;  %vm1511_vm0 = vmor %vm369_vm15, %vm370_vm11  ;;  %vm384_vm6 = vweird.f32 %v1271_v45  ;;  %v855_v0 = vsel %vm552_vm10, 1.0, %v994_v41 }
 0x189   : > { %v609_v19 = vsel %vm593_vm3, %v853_v9, 0.0  ;;  %v607_v31 = vsel %vm591_vm5, %v851_v46, 0.0  ;;  %vm631_vm5 = vcmp.le.f32.partialorder %v1382_v55, %v1253_v32  ;;  %v580_v20 = vadd.s32 56, %v1214_v2  ;;  %vm1540_vm8 = vmor %vm384_vm6, %vm385_vm4 }
 0x18a   : > { %v527_v13 = vpop.xlane.xlu1 %526  ;;  %v902_v28 = vpack.i.bf16 %v609_v19, %v608_v47  ;;  %v497_v39 = vpop.xlane.xlu2 %496  ;;  %v896_v63 = vpack.i.bf16 %v607_v31, %v606_v21  ;;  %vm639_vm15 = vmand %vm623_vm12, %vm631_vm5  ;;  %v1538_v45 = vsel %vm1499_vm1, 1.0, %v994_v41  ;;  %vm625_vm12 = vcmp.gt.f32.partialorder %v601_v11, %v1251_v14 }
 0x18b   : > { %v498_v8 = vcvt.f32.s32 %v497_v39  ;;  %v528_v23 = vcvt.f32.s32 %v527_v13  ;;  %vm633_vm11 = vcmp.le.f32.partialorder %v601_v11, %v1253_v32  ;;  %v1554_v33 = vsel %vm639_vm15, 1.0, %v994_v41  ;;  %vm640_vm5 = vmand %vm624_vm14, %vm632_vm7 }
 0x18c   : > { %903 = vperm.xlu0 %901, %v902_v28   ;;  %897 = vperm.xlu2 %895, %v896_v63   ;;  %v387_v61 = vsel %vm1540_vm8, %v1367_v48, %v383_v7  ;;  %v611_v34 = vsel %vm595_vm13, %v855_v0, 0.0  ;;  %vm389_vm10 = vcmp.eq.f32.partialorder %v388_v16, 8.507059e+37  ;;  %v589_v37 = vadd.s32 %v1230_v12, %v580_v20 }
 0x18d   : > { %v501_v17 = vadd.s32 %v1306_v56, %v498_v8  ;;  %v372_v56 = vsel %vm1511_vm0, %v1332_v15, %v368_v59  ;;  %v531_v57 = vadd.s32 %v1295_v50, %v528_v23  ;;  %v214_v15 = vld [vmem:[%s1029_s18 + $0x30] sm:$0xff]  ;;  %v602_v50 = vsel %vm594_vm2, %v362_v27, 0.0 }
 0x18e   : > { %v377_v48 = vsel %vm1469_vm9, %v1377_v53, %v372_v56  ;;  %v663_v24 = vmul.f32 %v1538_v45, %v1423_v4  ;;  %vm596_vm14 = vcmp.lt.s32.totalorder %v1485_v49, 200  ;;  %v392_v29 = vsel %vm389_vm10, %v391_v18, %v387_v61 }
 0x18f   : > { %vm551_vm3 = vcmp.eq.s32.totalorder %v501_v17, %v212_v10  ;;  %vm553_vm1 = vcmp.eq.s32.totalorder %v531_v57, %v214_v15  ;;  %v664_v53 = vmul.f32 %v1554_v33, %v1382_v55  ;;  %v1585_v12 = vsel %vm640_vm5, 1.0, %v994_v41  ;;  %v662_v15 = vld [vmem:[#allocation2] sm:$0x1] }
 0x190   : > { %v854_v26 = vsel %vm551_vm3, 1.0, %v994_v41  ;;  %v603_v4 = vsel %vm595_vm13, %v377_v48, 0.0  ;;  %vm626_vm9 = vcmp.gt.f32.partialorder %v602_v50, %v1251_v14  ;;  %vm634_vm7 = vcmp.le.f32.partialorder %v602_v50, %v1253_v32 }
 0x191   : > { %v610_v2 = vsel %vm594_vm2, %v854_v26, 0.0  ;;  %vm641_vm2 = vmand %vm625_vm12, %vm633_vm11  ;;  %v856_v9 = vsel %vm553_vm1, 1.0, %v994_v41  ;;  %vm597_vm0 = vcmp.lt.s32.totalorder %v589_v37, 200  ;;  %v671_v42 = vadd.f32 %v664_v53, %v663_v24 }
 0x192   : > { %v1549_v30 = vpop.xlane.xlu1 %287  ;;  %v542_v51 = vpop.xlane.xlu2 %541  ;;  %v908_v35 = vpack.i.bf16 %v611_v34, %v610_v2  ;;  %v1591_v36 = vsel %vm641_vm2, 1.0, %v994_v41  ;;  %v604_v55 = vsel %vm596_vm14, %v392_v29, 0.0  ;;  %v665_v60 = vmul.f32 %v1585_v12, %v1453_v40  ;;  %vm642_vm15 = vmand %vm626_vm9, %vm634_vm7 }
 0x193   : > { %948 = vrcp.f32 %v1549_v30  ;;  %v543_v25 = vcvt.f32.s32 %v542_v51  ;;  %vm627_vm13 = vcmp.gt.f32.partialorder %v603_v4, %v1251_v14  ;;  %v666_v47 = vmul.f32 %v1591_v36, %v601_v11 }
 0x194   : > { %909 = vperm.xlu1 %907, %v908_v35   ;;  %vm635_vm6 = vcmp.le.f32.partialorder %v603_v4, %v1253_v32  ;;  %v612_v19 = vsel %vm596_vm14, %v856_v9, 0.0  ;;  %vm628_vm3 = vcmp.gt.f32.partialorder %v604_v55, %v1251_v14  ;;  %vm636_vm8 = vcmp.le.f32.partialorder %v604_v55, %v1253_v32 }
 0x195   : > { %v546_v62 = vadd.s32 %v1349_v43, %v543_v25  ;;  %v672_v1 = vadd.f32 %v671_v42, %v665_v60  ;;  %v405_v13 = vand.u32 2147483648, %v1549_v30  ;;  %vm643_vm12 = vmand %vm627_vm13, %vm635_vm6  ;;  %v863_v21 = vsel %vm642_vm15, 1.0, %v994_v41 }
 0x196   : > { %v403_v28 = vand.u32 2147483647, %v1549_v30  ;;  %vm644_vm5 = vmand %vm628_vm3, %vm636_vm8  ;;  %vm399_vm10 = vweird.f32 %v1549_v30  ;;  %v667_v63 = vmul.f32 %v863_v21, %v602_v50  ;;  %v864_v49 = vsel %vm643_vm12, 1.0, %v994_v41 }
 0x197   : > { %vm554_vm4 = vcmp.eq.s32.totalorder %v546_v62, %v215_v38  ;;  %v673_v59 = vadd.f32 %v672_v1, %v666_v47  ;;  %v406_v3 = vor.u32 1.1754944e-38, %v405_v13  ;;  %v865_v8 = vsel %vm644_vm5, 1.0, %v994_v41 }
 0x198   : > { %v857_v54 = vsel %vm554_vm4, 1.0, %v994_v41  ;;  %vm404_vm1 = vcmp.eq.f32.partialorder %v403_v28, 8.507059e+37  ;;  %v669_v5 = vmul.f32 %v865_v8, %v604_v55  ;;  %v668_v7 = vmul.f32 %v864_v49, %v603_v4 }
 0x199   : > { %v949_v46 = vpop.eup %948  ;;  %v613_v52 = vsel %vm597_vm0, %v857_v54, 0.0  ;;  %v674_v23 = vadd.f32 %v673_v59, %v667_v63 }
 0x19a   : > { %v395_v43 = vmul.f32 %v949_v46, %v1549_v30  ;;  %v913_v58 = vpack.i.bf16 %v613_v52, %v612_v19  ;;  %vm400_vm11 = vweird.f32 %v949_v46 }
 0x19b   : > { %vm401_vm2 = vmor %vm399_vm10, %vm400_vm11  ;;  %v675_v17 = vadd.f32 %v674_v23, %v668_v7 }
 0x19c   : > { %v396_v40 = vsub.f32 1.0, %v395_v43  ;;  %914 = vperm.xlu2 %895, %v913_v58   ;;  %v686_v58 = vld [vmem:[#allocation3] sm:$0x1] }
 0x19d   : > { %v676_v44 = vadd.f32 %v675_v17, %v669_v5 }
 0x19e   : > { %v397_v31 = vmul.f32 %v949_v46, %v396_v40 }
 0x1a0   : > { %v398_v39 = vadd.f32 %v949_v46, %v397_v31 }
 0x1a2   : > { %v402_v27 = vsel %vm401_vm2, %v949_v46, %v398_v39 }
 0x1a3   : > { %v407_v10 = vsel %vm404_vm1, %v406_v3, %v402_v27 }
 0x1a4   : > { %v605_v6 = vsel %vm597_vm0, %v407_v10, 0.0 }
 0x1a5   : > { %vm629_vm14 = vcmp.gt.f32.partialorder %v605_v6, %v1251_v14  ;;  %vm637_vm9 = vcmp.le.f32.partialorder %v605_v6, %v1253_v32 }
 0x1a6   : > { %vm645_vm7 = vmand %vm629_vm14, %vm637_vm9 }
 0x1a7   : > { %v866_v11 = vsel %vm645_vm7, 1.0, %v994_v41 }
 0x1a8   : > { %v670_v16 = vmul.f32 %v866_v11, %v605_v6 }
 0x1aa   : > { %v677_v56 = vadd.f32 %v676_v44, %v670_v16 }
 0x1ac   : > { %v678_v0 = vrot.slane %v677_v56, 4 }
 0x1ae   : > { %v679_v20 = vadd.f32 %v678_v0, %v677_v56 }
 0x1b0   : > { %v680_v22 = vrot.slane %v679_v20, 2 }
 0x1b2   : > { %v681_v57 = vadd.f32 %v680_v22, %v679_v20 }
 0x1b4   : > { %v682_v26 = vrot.slane %v681_v57, 1 }
 0x1b6   : > { %v683_v30 = vadd.f32 %v682_v26, %v681_v57 }
 0x1b8   : > { %v684_v2 = vadd.f32 %v683_v30, %v662_v15 }
 0x1ba   : > { %685 = vst [vmem:[#allocation2] sm:$0x1] %v684_v2 }
 0x1e6   : > { %v898_v61 = vpop.permute.xlu2 %897 }
 0x1e7   : > { %v900_v14 = vunpack.i.h.bf16 %v898_v61  ;;  %v899_v50 = vunpack.i.l.bf16 %v898_v61 }
 0x1e9   : > { %v728_v34 = vmul.f32 %v900_v14, %v1554_v33  ;;  %v727_v41 = vmul.f32 %v899_v50, %v1538_v45 }
 0x1eb   : > { %v735_v51 = vadd.f32 %v728_v34, %v727_v41 }
 0x1f6   : > { %v915_v24 = vpop.permute.xlu2 %914 }
 0x1f7   : > { %v916_v4 = vunpack.i.l.bf16 %v915_v24  ;;  %v917_v42 = vunpack.i.h.bf16 %v915_v24 }
 0x1f9   : > { %v733_v33 = vmul.f32 %v916_v4, %v865_v8  ;;  %v734_v45 = vmul.f32 %v917_v42, %v866_v11 }
 0x1fe   : > { %v904_v32 = vpop.permute.xlu0 %903 }
 0x1ff   : > { %v905_v18 = vunpack.i.l.bf16 %v904_v32  ;;  %v906_v35 = vunpack.i.h.bf16 %v904_v32 }
 0x201   : > { %v729_v48 = vmul.f32 %v905_v18, %v1585_v12  ;;  %v730_v29 = vmul.f32 %v906_v35, %v1591_v36 }
 0x203   : > { %v736_v37 = vadd.f32 %v735_v51, %v729_v48 }
 0x205   : > { %v737_v62 = vadd.f32 %v736_v37, %v730_v29 }
 0x206   : > { %v910_v25 = vpop.permute.xlu1 %909 }
 0x207   : > { %v912_v38 = vunpack.i.h.bf16 %v910_v25  ;;  %v911_v53 = vunpack.i.l.bf16 %v910_v25 }
 0x209   : > { %v731_v9 = vmul.f32 %v911_v53, %v863_v21  ;;  %v732_v55 = vmul.f32 %v912_v38, %v864_v49 }
 0x20b   : > { %v738_v46 = vadd.f32 %v737_v62, %v731_v9 }
 0x20d   : > { %v739_v60 = vadd.f32 %v738_v46, %v732_v55 }
 0x20f   : > { %v740_v43 = vadd.f32 %v739_v60, %v733_v33 }
 0x211   : > { %v741_v12 = vadd.f32 %v740_v43, %v734_v45 }
 0x213   : > { %v742_v54 = vrot.slane %v741_v12, 4 }
 0x215   : > { %v743_v47 = vadd.f32 %v742_v54, %v741_v12 }
 0x217   : > { %v744_v19 = vrot.slane %v743_v47, 2 }
 0x219   : > { %v745_v52 = vadd.f32 %v744_v19, %v743_v47 }
 0x21b   : > { %v746_v40 = vrot.slane %v745_v52, 1 }
 0x21d   : > { %v747_v36 = vadd.f32 %v746_v40, %v745_v52  ;;  %753 = sbr.rel (%p867_p5) target bundleno = 741 (0x2e5), region = 36 }
 0x21f   : > { %v748_v1 = vadd.f32 %v747_v36, %v686_v58 }
 0x221   : > { %749 = vst [vmem:[#allocation3] sm:$0x1] %v748_v1 }
 0x222   : > { %v754_v13 = vld [vmem:[#allocation2] sm:$0x1]  ;;  %vm758_vm0 = vcmask 1040384   ;;  %v995_v39 = vmov 200.0   ;;  %vm779_vm13 = vcmask 0  }
 0x223   : > { %950 = vrcp.f32 %v995_v39 }
 0x228   : > { %v755_v21 = vld [vmem:[#allocation3] sm:$0x1] }
 0x229   : > { %v756_v31 = vsub.f32 %v754_v13, %v755_v21  ;;  %v951_v63 = vpop.eup %950 }
 0x22a   : > { %v770_v3 = vmul.f32 200.0, %v951_v63  ;;  %vm774_vm4 = vweird.f32 %v951_v63 }
 0x22b   : > { %v757_v28 = vand.u32 2147483647, %v756_v31 }
 0x22c   : > { %v771_v8 = vsub.f32 1.0, %v770_v3 }
 0x22d   : > { %v759_v59 = vsel %vm758_vm0, %v757_v28, 0.0 }
 0x22e   : > { %760 = vadd.xlane.f32.xlu0 %v759_v59  ;;  %v772_v10 = vmul.f32 %v951_v63, %v771_v8 }
 0x230   : > { %v773_v7 = vadd.f32 %v951_v63, %v772_v10 }
 0x232   : > { %v775_v16 = vsel %vm774_vm4, %v951_v63, %v773_v7 }
 0x2a1   : > { %v761_v49 = vpop.xlane.xlu0 %760 }
 0x2a2   : > { %v762_v27 = vrot.slane %v761_v49, 4 }
 0x2a4   : > { %v763_v23 = vadd.f32 %v762_v27, %v761_v49 }
 0x2a6   : > { %v764_v6 = vrot.slane %v763_v23, 2 }
 0x2a8   : > { %v765_v5 = vadd.f32 %v764_v6, %v763_v23 }
 0x2aa   : > { %v766_v17 = vrot.slane %v765_v5, 1 }
 0x2ac   : > { %v767_v11 = vadd.f32 %v766_v17, %v765_v5 }
 0x2ae   : > { %872 = vpush %v767_v11 }
 0x2af   : > { %874 = vpush %v775_v16 }
 0x2df   : > { %s873_s20 = spop %872 }
 0x2e0   : > { %s875_s21 = spop %874 }
 0x2e1   : > { %s777_s22 = smul.f32 %s875_s21, %s873_s20 }
 0x2e3   : > { %v778_v44 = vstv %s777_s22 }
 0x2e4   : > { %780 = vst.msk [vmem:[#allocation4] sm:$0x1] %vm779_vm13, %v778_v44 }
 0x2e5 PF: > { %p880_p6 = scmp.eq.s32.totalorder %s1018_s10, 3  ;;  %s996_s23 = smov [#allocation4]  }
 0x2e6   : > { %s787_s24 = sshll.u32 %s996_s23, 4  ;;  %s789_s27 = sshll.u32 %s1634_s2, 4  ;;  %s788_s24 = int_to_ptr.vmem [resolvable:$true] %s787_s24  ;;  %s790_s27 = int_to_ptr.hbm [resolvable:$true] %s789_s27 }
 0x2e7   : > { %877 = dma.vmem_to_hbm [thread:$0]  (%p880_p6), %s788_s24, 16, %s790_s27, [#allocation5]  }
 0x2e8   : > { %985 = dma.done.wait (%p880_p6), [#allocation5], 16  }
 0x2e9   : > { %987 = vsyncadd (%p880_p6), [#allocation5], 4294967280 }
 0x2ea PF: > { %s13_s9 = sadd.s32 1, %s990_s9  }
 0x2eb   : > { %p10_p7 = scmp.ge.s32.totalorder %s13_s9, 6  }
 0x2ed   :  { %12 = sbr.rel (!%p10_p7) target bundleno = 1 (0x1), region = 66 }
 0x2f2   :  { %803 = vsyncpa [#allocation5], 1 }
 0x2f3   :  { %805 = vsyncpa [#allocation5 + $0x1], 1 }

</bundles_post_ra>
